<compile_context>
chip_gen: v5e
topology: v5e:2x2
jax: 0.10.0
libtpu: 0.0.40
codegen_flags: <defaults>
</compile_context>

<pallas_src>
import jax
import jax.numpy as jnp
from jax.experimental import pallas as pl
from jax.experimental.pallas import tpu as pltpu


def _passthrough_kernel(scale_ref, x_ref, o_ref):
    # scale_ref: (1, L) resident block; x_ref/o_ref: (TM, L) tiles.
    # scale is pre-cast to x.dtype, so the multiply stays in the packed dtype.
    o_ref[...] = (scale_ref[...] * x_ref[...]).astype(o_ref.dtype)


def _sublane_multiple(dtype) -> int:
    itemsize = jnp.dtype(dtype).itemsize
    if itemsize >= 4:
        return 8
    if itemsize == 2:
        return 16
    return 32


def _vmem_capacity_bytes() -> int:
    """Best-effort trace-time query of per-core VMEM capacity."""
    try:
        info = pltpu.get_tpu_info()
        cap = getattr(info, "vmem_capacity_bytes", None)
        if cap is not None and cap > 0:
            return int(cap)
    except Exception:
        pass
    # Conservative fallback: smallest current generation (v7x, 64 MiB).
    return 64 * 1024 * 1024


def _choose_widening(rows: int, d: int, sub: int, target_lanes: int) -> int:
    """Pick k so that x:(rows, d) -> (rows/k, k*d) gives lane-dense stores."""
    # Preferred: smallest k with (k*d) % 128 == 0 (unmasked full-lane stores),
    # subject to rows % k == 0 and enough effective rows for a sublane tile.
    k = 1
    while k * d <= target_lanes:
        if rows % k == 0 and rows // k >= sub and (k * d) % 128 == 0:
            return k
        k += 1
    # Fallback: greedy doubling (original behavior).
    k = 1
    while (2 * k * d <= target_lanes) and (rows % (2 * k) == 0) and (rows // (2 * k) >= sub):
        k *= 2
    return k


def passthrough_forward(
    x: jax.Array,
    scale: jax.Array,
    *,
    target_lanes: int = 1024,
    donate_x: bool = False,
) -> jax.Array:
    """Applies per-feature scale along the last dim of x (Pallas elementwise kernel)."""
    orig_shape = x.shape
    d = scale.shape[0]
    assert orig_shape[-1] == d, "last dim of x must equal input_dim"

    x2 = x.reshape(-1, d)  # (rows, D) -- metadata-only row-major reshape
    rows = x2.shape[0]
    dtype_bytes = jnp.dtype(x.dtype).itemsize
    sub = _sublane_multiple(x.dtype)

    # Widen the lane axis: (rows, D) -> (rows/k, k*D), biased toward lane_w % 128 == 0.
    k = _choose_widening(rows, d, sub, target_lanes)
    lane_w = k * d
    rows_eff = rows // k
    x2 = x2.reshape(rows_eff, lane_w)  # still a free reshape
    # Tile scale to the widened lane axis and match x.dtype so the in-kernel
    # multiply does not promote the whole tile to f32.
    # TODO(synk): PyTorch would promote bf16 x * f32 scale to f32 output; we keep x.dtype.
    scale_row = jnp.tile(scale, (k,)).reshape(1, lane_w).astype(x.dtype)

    # Byte-only, dtype-aware tile height derived from real VMEM capacity.
    # 4 live tile buffers (double-buffered x in + double-buffered out) <= 25% of VMEM.
    vmem_cap = _vmem_capacity_bytes()
    tile_budget_bytes = vmem_cap // 4
    vmem_limit_bytes = (vmem_cap * 3) // 4
    per_buffer_bytes = tile_budget_bytes // 4
    max_rows_by_vmem = max(1, per_buffer_bytes // (lane_w * dtype_bytes))
    tile_rows = max(sub, (max_rows_by_vmem // sub) * sub)
    # Never use a tile taller than the (sublane-rounded) total row count.
    tile_rows = min(tile_rows, pl.cdiv(rows_eff, sub) * sub)

    grid_len = pl.cdiv(rows_eff, tile_rows)

    cost = pl.CostEstimate(
        flops=rows_eff * lane_w,
        transcendentals=0,
        bytes_accessed=2 * rows_eff * lane_w * dtype_bytes + lane_w * dtype_bytes,
    )

    call_kwargs = {}
    if donate_x:
        # x2 (input index 1) aliases the output buffer: no second rows x D HBM alloc.
        call_kwargs["input_output_aliases"] = {1: 0}

    out = pl.pallas_call(
        _passthrough_kernel,
        out_shape=jax.ShapeDtypeStruct((rows_eff, lane_w), x.dtype),
        grid_spec=pltpu.PrefetchScalarGridSpec(
            num_scalar_prefetch=0,
            grid=(grid_len,),
            in_specs=[
                pl.BlockSpec((1, lane_w), lambda i: (0, 0)),          # scale (resident)
                pl.BlockSpec((tile_rows, lane_w), lambda i: (i, 0)),  # x tile
            ],
            out_specs=pl.BlockSpec((tile_rows, lane_w), lambda i: (i, 0)),
        ),
        compiler_params=pltpu.CompilerParams(
            # Row grid is independent -> shard across both TensorCores on v7x.
            dimension_semantics=("parallel",),
            vmem_limit_bytes=vmem_limit_bytes,
        ),
        cost_estimate=cost,
        **call_kwargs,
    )(scale_row, x2)

    return out.reshape(orig_shape)


if __name__ == "__main__":
    # PassthroughLayerConfig: input_dim=128. Scale init is config-driven in
    # PyTorch (scale_init); here use deterministic random values so the
    # broadcast-multiply is actually exercised.
    input_dim = 128
    batch, seq = 2, 8

    key = jax.random.PRNGKey(0)
    kx, ks = jax.random.split(key)
    x = jax.random.normal(kx, (batch, seq, input_dim), dtype=jnp.float32)
    scale = jax.random.normal(ks, (input_dim,), dtype=jnp.float32)

    out = passthrough_forward(x, scale)
    out = jax.block_until_ready(out)

    # correctness check against the reference semantics
    ref = (scale[None, :] * x.reshape(-1, input_dim)).reshape(x.shape)
    assert out.shape == x.shape and out.dtype == x.dtype
    assert jnp.allclose(out, ref, atol=1e-6, rtol=1e-6)

    print("KERNEL_OK")
</pallas_src>

<mosaic_0001>
module attributes {stable_mosaic.version = 11 : i64} {
  func.func @_passthrough_kernel(%arg0: i32, %arg1: memref<1x128xf32, #tpu.memory_space<vmem>>, %arg2: memref<16x128xf32, #tpu.memory_space<vmem>>, %arg3: memref<16x128xf32, #tpu.memory_space<vmem>>) attributes {dimension_semantics = [#tpu.dimension_semantics<parallel>], iteration_bounds = array<i64: 1>, scalar_prefetch = 0 : i64, scratch_operands = 0 : i64, tpu.core_type = #tpu.core_type<tc>, window_params = [{pipeline_mode = #tpu.pipeline_mode<synchronous>, transform_indices = @transform_0, window_bounds = array<i64: 1, 128>}, {transform_indices = @transform_1, window_bounds = array<i64: 16, 128>}, {transform_indices = @transform_2, window_bounds = array<i64: 16, 128>}]} {
    %c0 = arith.constant 0 : index
    %c0_0 = arith.constant 0 : index
    %0 = vector.load %arg1[%c0, %c0_0] : memref<1x128xf32, #tpu.memory_space<vmem>>, vector<1x128xf32>
    %c0_1 = arith.constant 0 : index
    %c0_2 = arith.constant 0 : index
    %1 = vector.load %arg2[%c0_1, %c0_2] : memref<16x128xf32, #tpu.memory_space<vmem>>, vector<16x128xf32>
    %2 = vector.broadcast %0 : vector<1x128xf32> to vector<16x128xf32>
    %3 = arith.mulf %2, %1 : vector<16x128xf32>
    %c0_3 = arith.constant 0 : index
    %c0_4 = arith.constant 0 : index
    %4 = vector.load %arg3[%c0_3, %c0_4] : memref<16x128xf32, #tpu.memory_space<vmem>>, vector<16x128xf32>
    tpu.vector_store %arg3[%c0_3, %c0_4], %3 {strides = array<i32>} : memref<16x128xf32, #tpu.memory_space<vmem>>, vector<16x128xf32>,
    return
  }
  func.func @transform_0(%arg0: i32) -> (i32, i32) {
    %c0_i32 = arith.constant 0 : i32
    %c0_i32_0 = arith.constant 0 : i32
    %c0_i32_1 = arith.constant 0 : i32
    return %c0_i32, %c0_i32_0 : i32, i32
  }
  func.func @transform_1(%arg0: i32) -> (i32, i32) {
    %c0_i32 = arith.constant 0 : i32
    %c0_i32_0 = arith.constant 0 : i32
    return %arg0, %c0_i32 : i32, i32
  }
  func.func @transform_2(%arg0: i32) -> (i32, i32) {
    %c0_i32 = arith.constant 0 : i32
    %c0_i32_0 = arith.constant 0 : i32
    return %arg0, %c0_i32 : i32, i32
  }
}

</mosaic_0001>

<bundles_post_ra>
// kernel: tpu_custom_call.1
= control target key start
LH: loop header
LB: loop body
LE: loop exit
PB: predicated region body
PF: predicated region fallthrough
CT: control target
= control target key end

     0   :  { %7 = vsyncpa [#allocation3], 0  ;;  %s185_s0 = inlined_call_operand.hbm [shape: f32[1,128], index: 0, kind: input, shape index: {}]   ;;  %s186_s1 = inlined_call_operand.hbm [shape: f32[16,128], index: 1, kind: input, shape index: {}]   ;;  %s187_s2 = inlined_call_operand.hbm [shape: f32[16,128], index: 2, kind: output, shape index: {}]  }
   0x1   :  { %8 = vsyncpa [#allocation6], 0 }
   0x2   :  { %9 = vsyncpa [#allocation4], 0  ;;  %s15_s11 = sshll.u32 %s185_s0, 4  ;;  %s156_s12 = smov [#allocation2]   ;;  %s16_s11 = int_to_ptr.hbm [resolvable:$true] %s15_s11 }
   0x3   :  { %s17_s13 = sshll.u32 %s156_s12, 4  ;;  %s25_s16 = sshll.u32 %s186_s1, 4  ;;  %s18_s13 = int_to_ptr.vmem [resolvable:$true] %s17_s13  ;;  %s26_s16 = int_to_ptr.hbm [resolvable:$true] %s25_s16 }
   0x4   :  { %20 = dma.hbm_to_vmem [thread:$0]  %s16_s11, 16, %s18_s13, [#allocation3]  }
   0x5   :  { %s157_s17 = smov [#allocation5]   ;;  %s158_s19 = smov 128  }
   0x6   :  { %s27_s18 = sshll.u32 %s157_s17, 4  ;;  %s159_s20 = smov 8   ;;  %s28_s18 = int_to_ptr.vmem [resolvable:$true] %s27_s18 }
   0x7   :  { %33 = dma.hbm_to_vmem [thread:$0]  %s26_s16, 256, %s28_s18, [#allocation6], %s158_s19, %s158_s19, %s159_s20  }
   0x8   :  { %150 = dma.done.wait [#allocation3], 16  }
   0x9   :  { %151 = vsyncadd [#allocation3], 4294967280 }
   0xa   :  { %152 = dma.done.wait [#allocation6], 256  }
   0xb   :  { %153 = vsyncadd [#allocation6], 4294967040  ;;  %s58_s22 = sshll.u32 %s187_s2, 4  ;;  %v43_v0 = vld [vmem:[#allocation5] sm:$0xff]  ;;  %v77_v1 = vld [vmem:[#allocation2] ss:$0 sm:$0xff]  ;;  %s59_s22 = int_to_ptr.hbm [resolvable:$true] %s58_s22 }
   0xc   :  { %s160_s23 = smov [#allocation7]   ;;  %v44_v2 = vld [vmem:[#allocation5 + $0x8] sm:$0xff]  ;;  %v48_v3 = vmul.f32 %v77_v1, %v43_v0 }
   0xd   :  { %s56_s1 = sshll.u32 %s160_s23, 4  ;;  %v49_v4 = vmul.f32 %v77_v1, %v44_v2  ;;  %s57_s1 = int_to_ptr.vmem [resolvable:$true] %s56_s1 }
   0xe   :  { %50 = vst [vmem:[#allocation7] sm:$0xff] %v48_v3 }
   0xf   :  { %51 = vst [vmem:[#allocation7 + $0x8] sm:$0xff] %v49_v4 }
  0x10   :  { %64 = dma.vmem_to_hbm [thread:$0]  %s57_s1, 256, %s59_s22, [#allocation4], %s158_s19, %s158_s19, %s159_s20  }
  0x11   :  { %154 = dma.done.wait [#allocation4], 256  }
  0x12   :  { %155 = vsyncadd [#allocation4], 4294967040 }
  0x13   :  { %69 = vsyncpa [#allocation3], 1 }
  0x14   :  { %70 = vsyncpa [#allocation6], 1 }
  0x15   :  { %71 = vsyncpa [#allocation4], 1 }

</bundles_post_ra>
